<compile_context>
chip_gen: v6e
topology: v6e:2x2x1
jax: 0.10.0
libtpu: 0.0.40
codegen_flags: <defaults>
</compile_context>

<pallas_src>
import jax
import jax.numpy as jnp
from jax.experimental import pallas as pl
from jax.experimental.pallas import tpu as pltpu

LANE = 128     # last-dim (lane) granularity
SUBLANE = 8    # second-to-last-dim (sublane) granularity


def mlp_kernel(x_ref,
               w0_ref, w1_ref, w2_ref, w3_ref,
               b_ref,           # packed biases, (4, H_max_padded) f32
               out_ref):
    cdt = w0_ref.dtype  # compute dtype of the matmul operands (bf16 or f32)

    h = x_ref[...]

    # Bias slices below are STATIC and lane-aligned (all padded dims are
    # multiples of 128), so every VPU op stays lane-dense / unmasked.

    # layer 0: Linear(input_dim -> hidden_0) + ReLU  (bias/ReLU in f32)
    h = jnp.dot(h, w0_ref[...], preferred_element_type=jnp.float32)
    h = h + b_ref[0:1, :w0_ref.shape[1]]
    h = jnp.maximum(h, 0.0).astype(cdt)

    # layer 1: Linear(hidden_0 -> hidden_1) + ReLU
    h = jnp.dot(h, w1_ref[...], preferred_element_type=jnp.float32)
    h = h + b_ref[1:2, :w1_ref.shape[1]]
    h = jnp.maximum(h, 0.0).astype(cdt)

    # layer 2: Linear(hidden_1 -> hidden_2) + ReLU
    h = jnp.dot(h, w2_ref[...], preferred_element_type=jnp.float32)
    h = h + b_ref[2:3, :w2_ref.shape[1]]
    h = jnp.maximum(h, 0.0).astype(cdt)

    # output layer: Linear(hidden_2 -> output_dim), no activation
    y = jnp.dot(h, w3_ref[...], preferred_element_type=jnp.float32)
    y = y + b_ref[3:4, :w3_ref.shape[1]]
    out_ref[...] = y.astype(out_ref.dtype)


def _round_up(a, m):
    return -(-a // m) * m


def _pad_to(a, shape):
    pads = [(0, t - s) for s, t in zip(a.shape, shape)]
    return jnp.pad(a, pads)


def net_forward(x, params, *, tile_b_max=2048, compute_dtype=jnp.bfloat16):
    """params: list of (W, b) with W shaped (in_dim, out_dim), b shaped (out_dim,)."""
    (w0, b0), (w1, b1), (w2, b2), (w3, b3) = params
    B, d_in = x.shape
    out_dim = w3.shape[1]

    # ---- Feature-dim padding: every dim becomes a multiple of 128 lanes. ----
    dims = [d_in, w0.shape[1], w1.shape[1], w2.shape[1], w3.shape[1]]
    pdims = [_round_up(d, LANE) for d in dims]
    d_in_p, out_p = pdims[0], pdims[4]

    # ---- Batch tiling: minimal padding, largest sensible tile. ----
    # n_steps = ceil(round_up(B,8) / tile_b_max); tile_b ~ round_up(B,8)/n_steps
    # -> for small B this is grid=(1,) with the whole batch resident.
    b8 = _round_up(B, SUBLANE)
    n_steps = max(1, -(-b8 // tile_b_max))
    tile_b = _round_up(-(-b8 // n_steps), SUBLANE)
    b_pad = tile_b * n_steps

    # VMEM budget (worst case, double-buffered x/out tiles + weights):
    #   2*tile_b*d_in_p*2B + 2*tile_b*out_p*4B + ~2*sum(W)*2B + bias  << 32 MiB
    vmem_est = (2 * tile_b * d_in_p * 2 + 2 * tile_b * out_p * 4
                + 2 * sum(pi * po for pi, po in zip(pdims[:-1], pdims[1:])) * 2
                + 4 * max(pdims[1:]) * 4)
    assert vmem_est < 32 * 1024 * 1024, "working set exceeds scoped-VMEM default"

    # ---- Pad + cast operands (bf16 MXU operands, f32 accumulation inside). ----
    xp = _pad_to(x, (b_pad, d_in_p)).astype(compute_dtype)
    ws = [w0, w1, w2, w3]
    wps = [_pad_to(w, (pi, po)).astype(compute_dtype)
           for w, pi, po in zip(ws, pdims[:-1], pdims[1:])]
    h_max = max(pdims[1:])
    biases = jnp.stack(
        [_pad_to(b.astype(jnp.float32), (h_max,)) for b in [b0, b1, b2, b3]],
        axis=0)  # (4, h_max) f32 -> one input / one DMA descriptor

    grid = (n_steps,)

    def resident(a):
        # Full-array block, constant index_map -> stays in VMEM across steps
        # (Pallas skips re-DMA when the block index does not change).
        return pl.BlockSpec(a.shape, lambda i: (0,) * a.ndim)

    out = pl.pallas_call(
        mlp_kernel,
        out_shape=jax.ShapeDtypeStruct((b_pad, out_p), jnp.float32),
        grid=grid,
        in_specs=[pl.BlockSpec((tile_b, d_in_p), lambda i: (i, 0))]  # x: batch-tiled
                 + [resident(w) for w in wps]
                 + [resident(biases)],
        out_specs=pl.BlockSpec((tile_b, out_p), lambda i: (i, 0)),   # lane-dense out
        compiler_params=pltpu.CompilerParams(
            dimension_semantics=("parallel",)),  # 2-TC sharding on v7x when grid>1
    )(xp, *wps, biases)

    return out[:B, :out_dim]


def init_params(key, dims):
    """Deterministic init mimicking PyTorch Linear (uniform +/- 1/sqrt(fan_in)).

    dims = [input_dim, hidden_0, hidden_1, hidden_2, output_dim]
    Returns list of (W, b) with W stored as (in_dim, out_dim).
    """
    params = []
    for i in range(len(dims) - 1):
        fan_in, fan_out = dims[i], dims[i + 1]
        key, kw, kb = jax.random.split(key, 3)
        bound = 1.0 / jnp.sqrt(fan_in)
        w = jax.random.uniform(kw, (fan_in, fan_out), jnp.float32, -bound, bound)
        b = jax.random.uniform(kb, (fan_out,), jnp.float32, -bound, bound)
        params.append((w, b))
    return params


def reference_forward(x, params, compute_dtype=jnp.float32):
    """Pure-JAX reference; compute_dtype mirrors the kernel's operand casting."""
    h = x.astype(compute_dtype)
    n = len(params)
    for i, (w, b) in enumerate(params):
        h = jnp.dot(h, w.astype(compute_dtype),
                    preferred_element_type=jnp.float32) + b
        if i < n - 1:
            h = jnp.maximum(h, 0.0).astype(compute_dtype)
    return h.astype(jnp.float32)


if __name__ == "__main__":
    key = jax.random.PRNGKey(0)
    # small shapes consistent with the module's forward:
    # input_dim=16, hidden_0=32, hidden_1=32, hidden_2=32, output_dim=8, batch=8
    dims = [16, 32, 32, 32, 8]
    B = 8

    key, kx = jax.random.split(key)
    x = jax.random.normal(kx, (B, dims[0]), jnp.float32)
    params = init_params(key, dims)

    y = net_forward(x, params)
    jax.block_until_ready(y)

    assert y.shape == (B, dims[-1])

    # Tight check against a reference using the same bf16-operand / f32-accum math.
    y_ref_bf16 = reference_forward(x, params, jnp.bfloat16)
    assert jnp.allclose(y, y_ref_bf16, atol=1e-4, rtol=1e-4)

    # Looser sanity check against the full-f32 reference (bf16 rounding only).
    y_ref_f32 = reference_forward(x, params, jnp.float32)
    assert jnp.allclose(y, y_ref_f32, atol=1e-1, rtol=1e-1)

    print("KERNEL_OK")
</pallas_src>

<mosaic_0001>
module attributes {stable_mosaic.version = 11 : i64} {
  func.func @mlp_kernel(%arg0: i32, %arg1: memref<8x128xbf16, #tpu.memory_space<vmem>>, %arg2: memref<128x128xbf16, #tpu.memory_space<vmem>>, %arg3: memref<128x128xbf16, #tpu.memory_space<vmem>>, %arg4: memref<128x128xbf16, #tpu.memory_space<vmem>>, %arg5: memref<128x128xbf16, #tpu.memory_space<vmem>>, %arg6: memref<4x128xf32, #tpu.memory_space<vmem>>, %arg7: memref<8x128xf32, #tpu.memory_space<vmem>>) attributes {dimension_semantics = [#tpu.dimension_semantics<parallel>], iteration_bounds = array<i64: 1>, scalar_prefetch = 0 : i64, scratch_operands = 0 : i64, tpu.core_type = #tpu.core_type<tc>, window_params = [{transform_indices = @transform_0, window_bounds = array<i64: 8, 128>}, {pipeline_mode = #tpu.pipeline_mode<synchronous>, transform_indices = @transform_1, window_bounds = array<i64: 128, 128>}, {pipeline_mode = #tpu.pipeline_mode<synchronous>, transform_indices = @transform_2, window_bounds = array<i64: 128, 128>}, {pipeline_mode = #tpu.pipeline_mode<synchronous>, transform_indices = @transform_3, window_bounds = array<i64: 128, 128>}, {pipeline_mode = #tpu.pipeline_mode<synchronous>, transform_indices = @transform_4, window_bounds = array<i64: 128, 128>}, {pipeline_mode = #tpu.pipeline_mode<synchronous>, transform_indices = @transform_5, window_bounds = array<i64: 4, 128>}, {transform_indices = @transform_6, window_bounds = array<i64: 8, 128>}]} {
    %c0 = arith.constant 0 : index
    %c0_0 = arith.constant 0 : index
    %0 = vector.load %arg1[%c0, %c0_0] : memref<8x128xbf16, #tpu.memory_space<vmem>>, vector<8x128xbf16>
    %c0_1 = arith.constant 0 : index
    %c0_2 = arith.constant 0 : index
    %1 = vector.load %arg2[%c0_1, %c0_2] : memref<128x128xbf16, #tpu.memory_space<vmem>>, vector<128x128xbf16>
    %cst = arith.constant dense<0.000000e+00> : vector<8x128xf32>
    %2 = tpu.matmul %0, %1, %cst {dimension_numbers = #tpu.dot_dimension_numbers<[1], [0], [0], [1], [0, 0, 1, 1], [], []>} : vector<8x128xbf16>, vector<128x128xbf16>, vector<8x128xf32> -> vector<8x128xf32>
    %c0_3 = arith.constant 0 : index
    %c0_4 = arith.constant 0 : index
    %3 = vector.load %arg6[%c0_3, %c0_4] : memref<4x128xf32, #tpu.memory_space<vmem>>, vector<1x128xf32>
    %4 = vector.broadcast %3 : vector<1x128xf32> to vector<8x128xf32>
    %5 = arith.addf %2, %4 : vector<8x128xf32>
    %cst_5 = arith.constant 0.000000e+00 : f32
    %6 = vector.broadcast %cst_5 : f32 to vector<8x128xf32>
    %7 = arith.maximumf %5, %6 : vector<8x128xf32>
    %8 = arith.truncf %7 : vector<8x128xf32> to vector<8x128xbf16>
    %c0_6 = arith.constant 0 : index
    %c0_7 = arith.constant 0 : index
    %9 = vector.load %arg3[%c0_6, %c0_7] : memref<128x128xbf16, #tpu.memory_space<vmem>>, vector<128x128xbf16>
    %cst_8 = arith.constant dense<0.000000e+00> : vector<8x128xf32>
    %10 = tpu.matmul %8, %9, %cst_8 {dimension_numbers = #tpu.dot_dimension_numbers<[1], [0], [0], [1], [0, 0, 1, 1], [], []>} : vector<8x128xbf16>, vector<128x128xbf16>, vector<8x128xf32> -> vector<8x128xf32>
    %c1 = arith.constant 1 : index
    %c0_9 = arith.constant 0 : index
    %11 = vector.load %arg6[%c1, %c0_9] : memref<4x128xf32, #tpu.memory_space<vmem>>, vector<1x128xf32>
    %12 = vector.broadcast %11 : vector<1x128xf32> to vector<8x128xf32>
    %13 = arith.addf %10, %12 : vector<8x128xf32>
    %cst_10 = arith.constant 0.000000e+00 : f32
    %14 = vector.broadcast %cst_10 : f32 to vector<8x128xf32>
    %15 = arith.maximumf %13, %14 : vector<8x128xf32>
    %16 = arith.truncf %15 : vector<8x128xf32> to vector<8x128xbf16>
    %c0_11 = arith.constant 0 : index
    %c0_12 = arith.constant 0 : index
    %17 = vector.load %arg4[%c0_11, %c0_12] : memref<128x128xbf16, #tpu.memory_space<vmem>>, vector<128x128xbf16>
    %cst_13 = arith.constant dense<0.000000e+00> : vector<8x128xf32>
    %18 = tpu.matmul %16, %17, %cst_13 {dimension_numbers = #tpu.dot_dimension_numbers<[1], [0], [0], [1], [0, 0, 1, 1], [], []>} : vector<8x128xbf16>, vector<128x128xbf16>, vector<8x128xf32> -> vector<8x128xf32>
    %c2 = arith.constant 2 : index
    %c0_14 = arith.constant 0 : index
    %19 = vector.load %arg6[%c2, %c0_14] : memref<4x128xf32, #tpu.memory_space<vmem>>, vector<1x128xf32>
    %20 = vector.broadcast %19 : vector<1x128xf32> to vector<8x128xf32>
    %21 = arith.addf %18, %20 : vector<8x128xf32>
    %cst_15 = arith.constant 0.000000e+00 : f32
    %22 = vector.broadcast %cst_15 : f32 to vector<8x128xf32>
    %23 = arith.maximumf %21, %22 : vector<8x128xf32>
    %24 = arith.truncf %23 : vector<8x128xf32> to vector<8x128xbf16>
    %c0_16 = arith.constant 0 : index
    %c0_17 = arith.constant 0 : index
    %25 = vector.load %arg5[%c0_16, %c0_17] : memref<128x128xbf16, #tpu.memory_space<vmem>>, vector<128x128xbf16>
    %cst_18 = arith.constant dense<0.000000e+00> : vector<8x128xf32>
    %26 = tpu.matmul %24, %25, %cst_18 {dimension_numbers = #tpu.dot_dimension_numbers<[1], [0], [0], [1], [0, 0, 1, 1], [], []>} : vector<8x128xbf16>, vector<128x128xbf16>, vector<8x128xf32> -> vector<8x128xf32>
    %c3 = arith.constant 3 : index
    %c0_19 = arith.constant 0 : index
    %27 = vector.load %arg6[%c3, %c0_19] : memref<4x128xf32, #tpu.memory_space<vmem>>, vector<1x128xf32>
    %28 = vector.broadcast %27 : vector<1x128xf32> to vector<8x128xf32>
    %29 = arith.addf %26, %28 : vector<8x128xf32>
    %c0_20 = arith.constant 0 : index
    %c0_21 = arith.constant 0 : index
    %30 = vector.load %arg7[%c0_20, %c0_21] : memref<8x128xf32, #tpu.memory_space<vmem>>, vector<8x128xf32>
    tpu.vector_store %arg7[%c0_20, %c0_21], %29 {strides = array<i32>} : memref<8x128xf32, #tpu.memory_space<vmem>>, vector<8x128xf32>,
    return
  }
  func.func @transform_0(%arg0: i32) -> (i32, i32) {
    %c0_i32 = arith.constant 0 : i32
    %c0_i32_0 = arith.constant 0 : i32
    return %arg0, %c0_i32 : i32, i32
  }
  func.func @transform_1(%arg0: i32) -> (i32, i32) {
    %c0_i32 = arith.constant 0 : i32
    %c0_i32_0 = arith.constant 0 : i32
    %c0_i32_1 = arith.constant 0 : i32
    return %c0_i32, %c0_i32_0 : i32, i32
  }
  func.func @transform_2(%arg0: i32) -> (i32, i32) {
    %c0_i32 = arith.constant 0 : i32
    %c0_i32_0 = arith.constant 0 : i32
    %c0_i32_1 = arith.constant 0 : i32
    return %c0_i32, %c0_i32_0 : i32, i32
  }
  func.func @transform_3(%arg0: i32) -> (i32, i32) {
    %c0_i32 = arith.constant 0 : i32
    %c0_i32_0 = arith.constant 0 : i32
    %c0_i32_1 = arith.constant 0 : i32
    return %c0_i32, %c0_i32_0 : i32, i32
  }
  func.func @transform_4(%arg0: i32) -> (i32, i32) {
    %c0_i32 = arith.constant 0 : i32
    %c0_i32_0 = arith.constant 0 : i32
    %c0_i32_1 = arith.constant 0 : i32
    return %c0_i32, %c0_i32_0 : i32, i32
  }
  func.func @transform_5(%arg0: i32) -> (i32, i32) {
    %c0_i32 = arith.constant 0 : i32
    %c0_i32_0 = arith.constant 0 : i32
    %c0_i32_1 = arith.constant 0 : i32
    return %c0_i32, %c0_i32_0 : i32, i32
  }
  func.func @transform_6(%arg0: i32) -> (i32, i32) {
    %c0_i32 = arith.constant 0 : i32
    %c0_i32_0 = arith.constant 0 : i32
    return %arg0, %c0_i32 : i32, i32
  }
}

</mosaic_0001>

<bundles_post_ra>
// kernel: tpu_custom_call.1
= control target key start
LH: loop header
LB: loop body
LE: loop exit
PB: predicated region body
PF: predicated region fallthrough
CT: control target
= control target key end

     0   :  { %11 = vsyncpa [#allocation3], 0  ;;  %s1001_s0 = inlined_call_operand.hbm [shape: bf16[8,128], index: 0, kind: input, shape index: {}]   ;;  %s1002_s1 = inlined_call_operand.hbm [shape: bf16[128,128], index: 1, kind: input, shape index: {}]   ;;  %s1003_s2 = inlined_call_operand.hbm [shape: bf16[128,128], index: 2, kind: input, shape index: {}]   ;;  %s1004_s3 = inlined_call_operand.hbm [shape: bf16[128,128], index: 3, kind: input, shape index: {}]   ;;  %s1005_s4 = inlined_call_operand.hbm [shape: bf16[128,128], index: 4, kind: input, shape index: {}]   ;;  %s1006_s5 = inlined_call_operand.vmem [shape: f32[4,128], index: 5, kind: input, shape index: {}]   ;;  %s1007_s6 = inlined_call_operand.hbm [shape: f32[8,128], index: 6, kind: output, shape index: {}]  }
   0x1   :  { %12 = vsyncpa [#allocation6], 0 }
   0x2   :  { %13 = vsyncpa [#allocation9], 0 }
   0x3   :  { %14 = vsyncpa [#allocation4], 0  ;;  %s874_s21 = smov [#allocation5]  }
   0x4   :  { %s30_s22 = sshll.u32 %s874_s21, 4  ;;  %s31_s22 = int_to_ptr.vmem [resolvable:$true] %s30_s22 }
   0x5   :  { %s754_s23 = scalar_lea.vmem %s31_s22, 1024  ;;  %p759_p1 = scmp.lt.s32.totalorder %s31_s22, %s31_s22 }
   0x6   :  { %p755_p0 = scmp.ne.s32.totalorder %s31_s22, %s754_s23  ;;  %p760_p2 = scmp.lt.s32.totalorder %s754_s23, %s754_s23 }
   0x8   :  { %p761_p3 = por %p760_p2, %p759_p1 }
   0xa   :  { %p762_p4 = pnand %p761_p3, %p755_p0 }
   0xc   :  { %765 = shalt.err (!%p762_p4)
}
   0xd   :  { %s875_s24 = smov 64   ;;  %s876_s25 = smov 4  }
   0xe   :  { %36 = dma.hbm_to_vmem [thread:$0]  %s1002_s1, 1024, %s31_s22, [#allocation6], %s875_s24, %s875_s24, %s876_s25  }
   0xf   :  { %s877_s28 = smov [#allocation8]   ;;  %s878_s30 = smov [#allocation2]  }
  0x10   :  { %s54_s29 = sshll.u32 %s877_s28, 4  ;;  %s21_s7 = sshll.u32 %s878_s30, 4  ;;  %s55_s29 = int_to_ptr.vmem [resolvable:$true] %s54_s29  ;;  %s22_s7 = int_to_ptr.vmem [resolvable:$true] %s21_s7 }
  0x11   :  { %s774_s8 = scalar_lea.vmem %s55_s29, 1024  ;;  %p779_p6 = scmp.lt.s32.totalorder %s55_s29, %s55_s29 }
  0x12   :  { %p775_p5 = scmp.ne.s32.totalorder %s55_s29, %s774_s8  ;;  %p780_p7 = scmp.lt.s32.totalorder %s774_s8, %s774_s8 }
  0x14   :  { %p781_p8 = por %p780_p7, %p779_p6 }
  0x16   :  { %p782_p9 = pnand %p781_p8, %p775_p5 }
  0x18   :  { %785 = shalt.err (!%p782_p9)
}
  0x19   :  { %60 = dma.hbm_to_vmem [thread:$0]  %s1004_s3, 1024, %s55_s29, [#allocation9], %s875_s24, %s875_s24, %s876_s25  }
  0x1a   :  { %s794_s1 = scalar_lea.vmem %s22_s7, 64  ;;  %p799_p11 = scmp.lt.s32.totalorder %s22_s7, %s22_s7 }
  0x1b   :  { %p795_p10 = scmp.ne.s32.totalorder %s22_s7, %s794_s1  ;;  %p800_p12 = scmp.lt.s32.totalorder %s794_s1, %s794_s1 }
  0x1d   :  { %p801_p13 = por %p800_p12, %p799_p11 }
  0x1f   :  { %p802_p0 = pnand %p801_p13, %p795_p10 }
  0x21   :  { %805 = shalt.err (!%p802_p0)
}
  0x22   :  { %24 = dma.hbm_to_vmem [thread:$0]  %s1001_s0, 64, %s22_s7, [#allocation3]  }
  0x23   :  { %s879_s13 = smov [#allocation7]   ;;  %s880_s15 = smov [#allocation10]  }
  0x24   :  { %s42_s14 = sshll.u32 %s879_s13, 4  ;;  %s66_s16 = sshll.u32 %s880_s15, 4  ;;  %s43_s14 = int_to_ptr.vmem [resolvable:$true] %s42_s14  ;;  %s67_s16 = int_to_ptr.vmem [resolvable:$true] %s66_s16 }
  0x25   :  { %s814_s17 = scalar_lea.vmem %s43_s14, 1024  ;;  %p819_p2 = scmp.lt.s32.totalorder %s43_s14, %s43_s14 }
  0x26   :  { %p815_p1 = scmp.ne.s32.totalorder %s43_s14, %s814_s17  ;;  %p820_p3 = scmp.lt.s32.totalorder %s814_s17, %s814_s17 }
  0x28   :  { %p821_p4 = por %p820_p3, %p819_p2 }
  0x2a   :  { %p822_p5 = pnand %p821_p4, %p815_p1 }
  0x2c   :  { %825 = shalt.err (!%p822_p5)
}
  0x2d   :  { %48 = dma.hbm_to_vmem [thread:$0]  %s1003_s2, 1024, %s43_s14, [#allocation6], %s875_s24, %s875_s24, %s876_s25  }
  0x2e   :  { %s834_s0 = scalar_lea.vmem %s67_s16, 1024  ;;  %p839_p7 = scmp.lt.s32.totalorder %s67_s16, %s67_s16 }
  0x2f   :  { %p835_p6 = scmp.ne.s32.totalorder %s67_s16, %s834_s0  ;;  %p840_p8 = scmp.lt.s32.totalorder %s834_s0, %s834_s0 }
  0x31   :  { %p841_p9 = por %p840_p8, %p839_p7 }
  0x33   :  { %p842_p10 = pnand %p841_p9, %p835_p6 }
  0x35   :  { %845 = shalt.err (!%p842_p10)
}
  0x36   :  { %72 = dma.hbm_to_vmem [thread:$0]  %s1005_s4, 1024, %s67_s16, [#allocation9], %s875_s24, %s875_s24, %s876_s25  }
  0x37   :  { %866 = dma.done.wait [#allocation3], 64  }
  0x38   :  { %867 = vsyncadd [#allocation3], 4294967232 }
  0x39   :  { %868 = dma.done.wait [#allocation6], 2048  }
  0x3a   :  { %869 = vsyncadd [#allocation6], 4294965248 }
  0x3b   :  { %870 = dma.done.wait [#allocation9], 2048  }
  0x3c   :  { %871 = vsyncadd [#allocation9], 4294965248  ;;  %v881_v0 = vmov 0.0   ;;  %vm882_vm0 = vmmov 0   ;;  %v714_v1 = vld [vmem:[#allocation5 + $0x38] sm:$0xff]   ;;  %v715_v2 = vld [vmem:[#allocation5 + $0x30] sm:$0xff]  }
  0x3d   :  { %624 = vmatprep.subr.bf16.mxu0 %v881_v0  ;;  %640 = vmatprep.mubr.msk.bf16.mxu0 %vm882_vm0, %v881_v0  ;;  %v716_v3 = vld [vmem:[#allocation5 + $0x28] sm:$0xff]   ;;  %v722_v4 = vld [vmem:[#allocation7 + $0x38] sm:$0xff]   ;;  %v717_v5 = vld [vmem:[#allocation5 + $0x20] sm:$0xff]   ;;  %s883_s27 = smov [#allocation11]  }
  0x3e   :  { %644 = vmatprep.subr.bf16.mxu1 %v881_v0  ;;  %660 = vmatprep.mubr.msk.bf16.mxu1 %vm882_vm0, %v881_v0  ;;  %v723_v6 = vld [vmem:[#allocation7 + $0x30] sm:$0xff]   ;;  %v718_v7 = vld [vmem:[#allocation5 + $0x18] sm:$0xff]   ;;  %v724_v8 = vld [vmem:[#allocation7 + $0x28] sm:$0xff]   ;;  %s541_s28 = sshll.u32 %s883_s27, 4  ;;  %s542_s28 = int_to_ptr.vmem [resolvable:$true] %s541_s28 }
  0x3f   :  { %625 = vmatpush3.bf16.msra.mxu0 %v714_v1  ;;  %645 = vmatpush3.bf16.msra.mxu1 %v722_v4  ;;  %v719_v9 = vld [vmem:[#allocation5 + $0x10] sm:$0xff]   ;;  %v725_v10 = vld [vmem:[#allocation7 + $0x20] sm:$0xff]   ;;  %v720_v11 = vld [vmem:[#allocation5 + $0x8] sm:$0xff]   ;;  %s846_s29 = scalar_lea.vmem %s542_s28, 128  ;;  %p851_p12 = scmp.lt.s32.totalorder %s542_s28, %s542_s28 }
  0x40   :  { %626 = vmatprep.subr.bf16.mxu0 %v881_v0  ;;  %646 = vmatprep.subr.bf16.mxu1 %v881_v0  ;;  %v726_v12 = vld [vmem:[#allocation7 + $0x18] sm:$0xff]   ;;  %v721_v13 = vld [vmem:[#allocation5] sm:$0xff]   ;;  %v727_v14 = vld [vmem:[#allocation7 + $0x10] sm:$0xff]   ;;  %p847_p11 = scmp.ne.s32.totalorder %s542_s28, %s846_s29  ;;  %p852_p13 = scmp.lt.s32.totalorder %s846_s29, %s846_s29 }
  0x41   :  { %v91_v15 = vld [vmem:[#allocation2] sm:$0xf]  ;;  %v728_v16 = vld [vmem:[#allocation7 + $0x8] sm:$0xff]   ;;  %v729_v17 = vld [vmem:[#allocation7] sm:$0xff]  }
  0x42   :  { %v730_v18 = vld [vmem:[#allocation8 + $0x38] sm:$0xff]   ;;  %v731_v19 = vld [vmem:[#allocation8 + $0x30] sm:$0xff]   ;;  %v732_v20 = vld [vmem:[#allocation8 + $0x28] sm:$0xff]   ;;  %p853_p0 = por %p852_p13, %p851_p12 }
  0x43   :  { %627 = vmatpush3.bf16.msra.mxu0 %v715_v2  ;;  %647 = vmatpush3.bf16.msra.mxu1 %v723_v6  ;;  %v733_v21 = vld [vmem:[#allocation8 + $0x20] sm:$0xff]   ;;  %v734_v22 = vld [vmem:[#allocation8 + $0x18] sm:$0xff]   ;;  %v735_v23 = vld [vmem:[#allocation8 + $0x10] sm:$0xff]  }
  0x44   :  { %628 = vmatprep.subr.bf16.mxu0 %v881_v0  ;;  %648 = vmatprep.subr.bf16.mxu1 %v881_v0  ;;  %v552_v24 = vld [vmem:[%s1006_s5] ss:$0 sm:$0xff]  ;;  %v736_v32 = vld [vmem:[#allocation8 + $0x8] sm:$0xff]   ;;  %v737_v33 = vld [vmem:[#allocation8] sm:$0xff]   ;;  %p854_p1 = pnand %p853_p0, %p847_p11 }
  0x45   :  { %v738_v34 = vld [vmem:[#allocation10 + $0x38] sm:$0xff]   ;;  %v739_v35 = vld [vmem:[#allocation10 + $0x30] sm:$0xff]   ;;  %v740_v36 = vld [vmem:[#allocation10 + $0x28] sm:$0xff]  }
  0x46   :  { %v741_v37 = vld [vmem:[#allocation10 + $0x20] sm:$0xff]   ;;  %v742_v38 = vld [vmem:[#allocation10 + $0x18] sm:$0xff]   ;;  %v743_v39 = vld [vmem:[#allocation10 + $0x10] sm:$0xff]  }
  0x47   :  { %629 = vmatpush3.bf16.msra.mxu0 %v716_v3  ;;  %649 = vmatpush3.bf16.msra.mxu1 %v724_v8  ;;  %v561_v40 = vld [vmem:[%s1006_s5 + $0x1] ss:$0 sm:$0xff]  ;;  %v744_v48 = vld [vmem:[#allocation10 + $0x8] sm:$0xff]   ;;  %v745_v49 = vld [vmem:[#allocation10] sm:$0xff]  }
  0x48   :  { %630 = vmatprep.subr.bf16.mxu0 %v881_v0  ;;  %650 = vmatprep.subr.bf16.mxu1 %v881_v0  ;;  %v570_v50 = vld [vmem:[%s1006_s5 + $0x2] ss:$0 sm:$0xff]  ;;  %v579_v58 = vld [vmem:[%s1006_s5 + $0x3] ss:$0 sm:$0xff] }
  0x4b   :  { %631 = vmatpush3.bf16.msra.mxu0 %v717_v5  ;;  %651 = vmatpush3.bf16.msra.mxu1 %v725_v10 }
  0x4c   :  { %632 = vmatprep.subr.bf16.mxu0 %v881_v0  ;;  %652 = vmatprep.subr.bf16.mxu1 %v881_v0 }
  0x4f   :  { %633 = vmatpush3.bf16.msra.mxu0 %v718_v7  ;;  %653 = vmatpush3.bf16.msra.mxu1 %v726_v12 }
  0x50   :  { %634 = vmatprep.subr.bf16.mxu0 %v881_v0  ;;  %654 = vmatprep.subr.bf16.mxu1 %v881_v0 }
  0x53   :  { %635 = vmatpush3.bf16.msra.mxu0 %v719_v9  ;;  %655 = vmatpush3.bf16.msra.mxu1 %v727_v14 }
  0x54   :  { %636 = vmatprep.subr.bf16.mxu0 %v881_v0  ;;  %656 = vmatprep.subr.bf16.mxu1 %v881_v0 }
  0x57   :  { %637 = vmatpush3.bf16.msra.mxu0 %v720_v11  ;;  %657 = vmatpush3.bf16.msra.mxu1 %v728_v16 }
  0x58   :  { %638 = vmatprep.subr.bf16.mxu0 %v881_v0  ;;  %658 = vmatprep.subr.bf16.mxu1 %v881_v0 }
  0x5b   :  { %639 = vmatpush3.bf16.msra.mxu0 %v721_v13  ;;  %659 = vmatpush3.bf16.msra.mxu1 %v729_v17 }
  0x5c   :  { %664 = vmatprep.subr.bf16.mxu0 %v881_v0  ;;  %684 = vmatprep.subr.bf16.mxu1 %v881_v0 }
  0x5e   :  { %641 = vmatmul.mubr.bf16.vlgmr.msra.gmra.mxu0 %v91_v15 }
  0x5f   :  { %680 = vmatprep.mubr.msk.bf16.mxu0 %vm882_vm0, %v881_v0  ;;  %665 = vmatpush3.bf16.msra.mxu0 %v730_v18 }
  0x60   :  { %666 = vmatprep.subr.bf16.mxu0 %v881_v0 }
  0x63   :  { %667 = vmatpush3.bf16.msra.mxu0 %v731_v19 }
  0x64   :  { %668 = vmatprep.subr.bf16.mxu0 %v881_v0 }
  0x67   :  { %669 = vmatpush3.bf16.msra.mxu0 %v732_v20 }
  0x68   :  { %670 = vmatprep.subr.bf16.mxu0 %v881_v0 }
  0x6b   :  { %671 = vmatpush3.bf16.msra.mxu0 %v733_v21 }
  0x6c   :  { %672 = vmatprep.subr.bf16.mxu0 %v881_v0 }
  0x6f   :  { %673 = vmatpush3.bf16.msra.mxu0 %v734_v22 }
  0x70   :  { %674 = vmatprep.subr.bf16.mxu0 %v881_v0 }
  0x73   :  { %675 = vmatpush3.bf16.msra.mxu0 %v735_v23 }
  0x74   :  { %676 = vmatprep.subr.bf16.mxu0 %v881_v0 }
  0x77   :  { %677 = vmatpush3.bf16.msra.mxu0 %v736_v32 }
  0x78   :  { %678 = vmatprep.subr.bf16.mxu0 %v881_v0 }
  0x7b   :  { %679 = vmatpush3.bf16.msra.mxu0 %v737_v33 }
 0x11e   :  { %v195_v25 = vpop.f32.mrf.mxu0 }
 0x11f   :  { %v196_v26 = vadd.f32 %v552_v24, %v195_v25 }
 0x120   :  { %v642_v27 = vpop.f32.mrf.mxu0 }
 0x121   :  { %v201_v28 = vmax.f32 %v196_v26, 0.0 }
 0x122   :  { %v198_v29 = vpop.f32.mrf.mxu0 }
 0x123   :  { %v202_v30 = vpack.c.bf16 %v201_v28, %v201_v28 }
 0x124   :  { %v643_v31 = vpop.f32.mrf.mxu0 }
 0x125   :  { %661 = vmatmul.mubr.bf16.vlgmr.msra.gmra.mxu1 %v202_v30 }
 0x126   :  { %700 = vmatprep.mubr.msk.bf16.mxu1 %vm882_vm0, %v881_v0  ;;  %685 = vmatpush3.bf16.msra.mxu1 %v738_v34 }
 0x127   :  { %686 = vmatprep.subr.bf16.mxu1 %v881_v0 }
 0x12a   :  { %687 = vmatpush3.bf16.msra.mxu1 %v739_v35 }
 0x12b   :  { %688 = vmatprep.subr.bf16.mxu1 %v881_v0 }
 0x12e   :  { %689 = vmatpush3.bf16.msra.mxu1 %v740_v36 }
 0x12f   :  { %690 = vmatprep.subr.bf16.mxu1 %v881_v0 }
 0x132   :  { %691 = vmatpush3.bf16.msra.mxu1 %v741_v37 }
 0x133   :  { %692 = vmatprep.subr.bf16.mxu1 %v881_v0 }
 0x136   :  { %693 = vmatpush3.bf16.msra.mxu1 %v742_v38 }
 0x137   :  { %694 = vmatprep.subr.bf16.mxu1 %v881_v0 }
 0x13a   :  { %695 = vmatpush3.bf16.msra.mxu1 %v743_v39 }
 0x13b   :  { %696 = vmatprep.subr.bf16.mxu1 %v881_v0 }
 0x13e   :  { %697 = vmatpush3.bf16.msra.mxu1 %v744_v48 }
 0x13f   :  { %698 = vmatprep.subr.bf16.mxu1 %v881_v0 }
 0x142   :  { %699 = vmatpush3.bf16.msra.mxu1 %v745_v49 }
 0x1e5   :  { %v306_v41 = vpop.f32.mrf.mxu1 }
 0x1e6   :  { %v307_v42 = vadd.f32 %v561_v40, %v306_v41 }
 0x1e7   :  { %v662_v43 = vpop.f32.mrf.mxu1 }
 0x1e8   :  { %v312_v44 = vmax.f32 %v307_v42, 0.0 }
 0x1e9   :  { %v309_v45 = vpop.f32.mrf.mxu1 }
 0x1ea   :  { %v313_v46 = vpack.c.bf16 %v312_v44, %v312_v44 }
 0x1eb   :  { %v663_v47 = vpop.f32.mrf.mxu1 }
 0x1ec   :  { %681 = vmatmul.mubr.bf16.vlgmr.msra.gmra.mxu0 %v313_v46 }
 0x2ac   :  { %v417_v51 = vpop.f32.mrf.mxu0 }
 0x2ad   :  { %v418_v52 = vadd.f32 %v570_v50, %v417_v51 }
 0x2ae   :  { %v682_v53 = vpop.f32.mrf.mxu0 }
 0x2af   :  { %v423_v54 = vmax.f32 %v418_v52, 0.0 }
 0x2b0   :  { %v420_v55 = vpop.f32.mrf.mxu0 }
 0x2b1   :  { %v424_v56 = vpack.c.bf16 %v423_v54, %v423_v54 }
 0x2b2   :  { %v683_v57 = vpop.f32.mrf.mxu0 }
 0x2b3   :  { %701 = vmatmul.mubr.bf16.vlgmr.msra.gmra.mxu1 %v424_v56 }
 0x373   :  { %v528_v59 = vpop.f32.mrf.mxu1 }
 0x374   :  { %v529_v60 = vadd.f32 %v579_v58, %v528_v59 }
 0x375   :  { %v702_v61 = vpop.f32.mrf.mxu1 }
 0x376   :  { %534 = vst [vmem:[#allocation11] sm:$0xff] %v529_v60 }
 0x377   :  { %v531_v62 = vpop.f32.mrf.mxu1 }
 0x378   :  { %857 = shalt.err (!%p854_p1)
}
 0x379   :  { %544 = dma.vmem_to_hbm [thread:$0]  %s542_s28, 128, %s1007_s6, [#allocation4]   ;;  %v703_v63 = vpop.f32.mrf.mxu1 }
 0x37a   :  { %872 = dma.done.wait [#allocation4], 128  }
 0x37b   :  { %873 = vsyncadd [#allocation4], 4294967168 }
 0x37c   :  { %548 = vsyncpa [#allocation3], 1 }
 0x37d   :  { %549 = vsyncpa [#allocation6], 1 }
 0x37e   :  { %550 = vsyncpa [#allocation9], 1 }
 0x37f   :  { %551 = vsyncpa [#allocation4], 1 }

</bundles_post_ra>
